<compile_context>
chip_gen: v5e
topology: v5e:2x2
jax: 0.10.0
libtpu: 0.0.40
codegen_flags: <defaults>
</compile_context>

<pallas_src>
import functools
import math

import jax
import jax.numpy as jnp
from jax.experimental import pallas as pl
from jax.experimental.pallas import tpu as pltpu


def _round_up(x, m):
    return ((x + m - 1) // m) * m


def _supports_bf16_elementwise():
    """True on TPU generations whose VPU/EUP handle bf16 natively (v6e, v7x)."""
    try:
        kind = jax.devices()[0].device_kind.lower()
    except Exception:
        return False
    return not any(g in kind for g in ("v2", "v3", "v4", "v5"))


# ------------------------------- kernel ------------------------------------ #

def _fused_actor_critic_kernel(
    state_ref, action_ref,
    w1_ref, b1_ref, w2_ref, b2_ref, w3_ref, b3_ref,
    inv_var_ref, logp_const_ref,
    out_ref,
    *, action_dim, matmul_dtype, act_dtype,
):
    """One batch tile: fused actor+critic MLP + diagonal-Gaussian log_prob.

    out_ref[:, 0] = log_prob(action), out_ref[:, 1] = state value.
    """
    x = state_ref[...].astype(matmul_dtype)                       # [Tb, S]

    # Hidden layers: MXU matmuls in matmul_dtype; bias + tanh in act_dtype
    # (bf16 on v6e/v7x halves EUP time and spill traffic, f32 kept on v5e).
    h = jnp.tanh(jnp.dot(x, w1_ref[...],
                         preferred_element_type=act_dtype) + b1_ref[...])
    h = jnp.tanh(jnp.dot(h.astype(matmul_dtype), w2_ref[...],
                         preferred_element_type=act_dtype) + b2_ref[...])

    # Head layer (actor mean | critic value | zero pad), kept in f32 so PPO
    # importance-ratio log-probs stay accurate; padded to 128 output lanes.
    z = jnp.dot(h.astype(jnp.float32), w3_ref[...],
                preferred_element_type=jnp.float32) + b3_ref[...]  # [Tb, 128]
    zt = jnp.tanh(z)                 # full-vreg tanh (same cost as A lanes)

    # Diagonal-Gaussian log-prob; constants hoisted to the wrapper.
    diff = action_ref[...] - zt[:, :action_dim]                    # [Tb, A]
    quad = jnp.sum(diff * diff * inv_var_ref[...], axis=-1, keepdims=True)
    logp = logp_const_ref[0, 0] - 0.5 * quad                        # [Tb, 1]
    value = z[:, action_dim:action_dim + 1]                         # [Tb, 1]

    out_ref[...] = jnp.concatenate([logp, value], axis=-1)          # one store


# ------------------------------ wrappers ----------------------------------- #

def fuse_evaluate_params(params, action_var, *, matmul_dtype=jnp.bfloat16,
                         act_dtype=None):
    """One-time fusion of actor/critic weights + Gaussian constants.

    Call once per parameter update (outside the PPO minibatch loop) and pass
    the result to actor_critic_evaluate(); doing this per call would emit
    extra XLA concat/pad/cast kernels on every evaluate().
    """
    if act_dtype is None:
        act_dtype = (jnp.bfloat16
                     if (matmul_dtype == jnp.bfloat16
                         and _supports_bf16_elementwise())
                     else jnp.float32)

    f32 = jnp.float32
    S = params["w1"].shape[0]
    H = params["w2"].shape[0]                         # 64
    A = params["w3"].shape[1]
    head_cols = _round_up(A + 1, 128)                 # pad heads to lane width

    z_hh = jnp.zeros((H, H), f32)
    w1f = jnp.concatenate([params["w1"], params["wc1"]], axis=1).astype(matmul_dtype)
    w2f = jnp.block([[params["w2"], z_hh],
                     [z_hh, params["wc2"]]]).astype(matmul_dtype)   # [128, 128]

    pad_a = jnp.zeros((H, head_cols - A - 1), f32)
    w3f = jnp.concatenate([
        jnp.concatenate([params["w3"], jnp.zeros((H, 1), f32), pad_a], axis=1),
        jnp.concatenate([jnp.zeros((H, A), f32), params["wc3"], pad_a], axis=1),
    ], axis=0)                                                      # [128, head_cols]

    b1f = jnp.concatenate([params["b1"], params["bc1"]], axis=1).astype(act_dtype)
    b2f = jnp.concatenate([params["b2"], params["bc2"]], axis=1).astype(act_dtype)
    b3f = jnp.concatenate([params["b3"], params["bc3"],
                           jnp.zeros((1, head_cols - A - 1), f32)], axis=1)

    inv_var = (1.0 / action_var).astype(f32).reshape(1, A)
    log2pi = math.log(2.0 * math.pi)
    logdet = jnp.sum(jnp.log(action_var))
    logp_const = (-0.5 * (A * log2pi + logdet)).reshape(1, 1).astype(f32)
    entropy = (0.5 * A * (1.0 + log2pi) + 0.5 * logdet).astype(f32)

    return dict(w1f=w1f, b1f=b1f, w2f=w2f, b2f=b2f, w3f=w3f, b3f=b3f,
                inv_var=inv_var, logp_const=logp_const, entropy=entropy,
                action_dim=A, state_dim=S,
                matmul_dtype=matmul_dtype, act_dtype=act_dtype)


def actor_critic_evaluate(state, action, fused, *, tile_b=4096):
    """Pallas implementation of ActorCritic.evaluate (continuous actions).

    state:  [B, state_dim] f32, action: [B, action_dim] f32,
    fused:  output of fuse_evaluate_params().
    Returns (action_logprobs [B], state_values [B, 1], dist_entropy [B]).
    """
    B, S = state.shape
    A = fused["action_dim"]
    matmul_dtype = fused["matmul_dtype"]
    act_dtype = fused["act_dtype"]
    w1f, b1f = fused["w1f"], fused["b1f"]
    w2f, b2f = fused["w2f"], fused["b2f"]
    w3f, b3f = fused["w3f"], fused["b3f"]
    inv_var, logp_const = fused["inv_var"], fused["logp_const"]
    head_cols = w3f.shape[1]

    # Batch tiling: large tiles amortize ~0.35us/step overhead; keep grid >= 2
    # whenever possible so the "parallel" axis splits across v7x's two TCs.
    tb = min(_round_up(tile_b, 8), _round_up(B, 8))
    if B >= 16:
        tb = min(tb, _round_up(pl.cdiv(B, 2), 8))
    grid = (pl.cdiv(B, tb),)

    def batch_spec(cols):
        return pl.BlockSpec((tb, cols), lambda i: (i, 0))

    def resident_spec(shape):
        # Full-array block with constant index_map -> stays VMEM-resident.
        return pl.BlockSpec(shape, lambda i: (0, 0))

    w_bytes = int(w1f.size * w1f.dtype.itemsize + w2f.size * w2f.dtype.itemsize
                  + w3f.size * 4
                  + (b1f.size + b2f.size) * b1f.dtype.itemsize
                  + b3f.size * 4 + inv_var.size * 4)
    cost = pl.CostEstimate(
        flops=2 * B * (S * 128 + 128 * 128 + 128 * head_cols),
        transcendentals=B * (128 + 128 + head_cols),
        bytes_accessed=B * (S + A + 2) * 4 + w_bytes,
    )

    # Scoped-VMEM budget: double-buffered in/out blocks + resident weights +
    # headroom for [tb, 128] f32 intermediates; capped at v7x's 64 MiB.
    vmem_est = 2 * tb * (S + A + 2) * 4 + w_bytes + 6 * tb * 128 * 4 + (4 << 20)
    vmem_limit = int(min(max(vmem_est, 32 << 20), 64 << 20))

    out = pl.pallas_call(
        functools.partial(_fused_actor_critic_kernel,
                          action_dim=A, matmul_dtype=matmul_dtype,
                          act_dtype=act_dtype),
        grid=grid,
        in_specs=[
            batch_spec(S), batch_spec(A),
            resident_spec(w1f.shape), resident_spec(b1f.shape),
            resident_spec(w2f.shape), resident_spec(b2f.shape),
            resident_spec(w3f.shape), resident_spec(b3f.shape),
            resident_spec(inv_var.shape),
            pl.BlockSpec(memory_space=pltpu.MemorySpace.SMEM),   # logp_const scalar
        ],
        out_specs=batch_spec(2),
        out_shape=jax.ShapeDtypeStruct((B, 2), jnp.float32),
        compiler_params=pltpu.CompilerParams(
            dimension_semantics=("parallel",),       # megacore split on v7x
            vmem_limit_bytes=vmem_limit),
        cost_estimate=cost,
    )(state, action, w1f, b1f, w2f, b2f, w3f, b3f, inv_var, logp_const)

    entropy = jnp.broadcast_to(fused["entropy"], (B,))
    return out[:, 0], out[:, 1:2], entropy


# ------------------------ reference / test scaffolding --------------------- #

def _torch_linear_init(key, fan_in, fan_out):
    """Deterministic init mimicking nn.Linear (uniform +-1/sqrt(fan_in))."""
    kw, kb = jax.random.split(key)
    bound = 1.0 / math.sqrt(fan_in)
    w = jax.random.uniform(kw, (fan_in, fan_out), jnp.float32, -bound, bound)
    b = jax.random.uniform(kb, (1, fan_out), jnp.float32, -bound, bound)
    return w, b


def make_params(key, state_dim, action_dim):
    keys = jax.random.split(key, 6)
    w1, b1 = _torch_linear_init(keys[0], state_dim, 64)
    w2, b2 = _torch_linear_init(keys[1], 64, 64)
    w3, b3 = _torch_linear_init(keys[2], 64, action_dim)
    wc1, bc1 = _torch_linear_init(keys[3], state_dim, 64)
    wc2, bc2 = _torch_linear_init(keys[4], 64, 64)
    wc3, bc3 = _torch_linear_init(keys[5], 64, 1)
    return dict(w1=w1, b1=b1, w2=w2, b2=b2, w3=w3, b3=b3,
                wc1=wc1, bc1=bc1, wc2=wc2, bc2=bc2, wc3=wc3, bc3=bc3)


def reference_evaluate(state, action, params, action_var):
    """Pure-JAX f32 reference mirroring torch semantics."""
    h = jnp.tanh(state @ params["w1"] + params["b1"])
    h = jnp.tanh(h @ params["w2"] + params["b2"])
    mean = jnp.tanh(h @ params["w3"] + params["b3"])
    c = jnp.tanh(state @ params["wc1"] + params["bc1"])
    c = jnp.tanh(c @ params["wc2"] + params["bc2"])
    values = c @ params["wc3"] + params["bc3"]
    A = action.shape[1]
    log2pi = math.log(2.0 * math.pi)
    logdet = jnp.sum(jnp.log(action_var))
    diff = action - mean
    quad = jnp.sum(diff * diff / action_var, axis=-1)
    logp = -0.5 * (quad + A * log2pi + logdet)
    ent = jnp.full((state.shape[0],), 0.5 * A * (1.0 + log2pi) + 0.5 * logdet)
    return logp, values, ent


if __name__ == "__main__":
    state_dim = 16
    action_dim = 4
    batch = 8
    action_std_init = 0.6

    key = jax.random.PRNGKey(0)
    kp, ks, ka = jax.random.split(key, 3)

    params = make_params(kp, state_dim, action_dim)
    action_var = jnp.full((1, action_dim), action_std_init * action_std_init,
                          dtype=jnp.float32)

    state = jax.random.normal(ks, (batch, state_dim), dtype=jnp.float32)
    action = jax.random.normal(ka, (batch, action_dim), dtype=jnp.float32)

    r_logp, r_values, r_ent = reference_evaluate(state, action, params, action_var)

    # ---- exactness check: all-f32 path must match the torch-style reference ----
    fused32 = fuse_evaluate_params(params, action_var, matmul_dtype=jnp.float32)
    logp32, values32, ent32 = actor_critic_evaluate(state, action, fused32)
    jax.block_until_ready((logp32, values32, ent32))
    assert jnp.allclose(logp32, r_logp, atol=1e-4), "logprob mismatch (f32 path)"
    assert jnp.allclose(values32, r_values, atol=1e-4), "value mismatch (f32 path)"
    assert jnp.allclose(ent32, r_ent, atol=1e-5), "entropy mismatch (f32 path)"

    # ---- default fast path: bf16 hidden matmuls (bf16 activations on v6e/v7x,
    # ---- f32 on v5e), heads kept in f32 for log-prob accuracy ----
    fused = fuse_evaluate_params(params, action_var)
    logp16, values16, ent16 = actor_critic_evaluate(state, action, fused)
    jax.block_until_ready((logp16, values16, ent16))
    assert jnp.allclose(logp16, r_logp, atol=3e-1), "logprob mismatch (fast path)"
    assert jnp.allclose(values16, r_values, atol=5e-2), "value mismatch (fast path)"
    assert jnp.allclose(ent16, r_ent, atol=1e-5), "entropy mismatch (fast path)"

    print("KERNEL_OK")
</pallas_src>

<mosaic_0001>
module attributes {stable_mosaic.version = 11 : i64} {
  func.func @_fused_actor_critic_kernel(%arg0: i32, %arg1: memref<8x16xf32, #tpu.memory_space<vmem>>, %arg2: memref<8x4xf32, #tpu.memory_space<vmem>>, %arg3: memref<16x128xf32, #tpu.memory_space<vmem>>, %arg4: memref<1x128xf32, #tpu.memory_space<vmem>>, %arg5: memref<128x128xf32, #tpu.memory_space<vmem>>, %arg6: memref<1x128xf32, #tpu.memory_space<vmem>>, %arg7: memref<128x128xf32, #tpu.memory_space<vmem>>, %arg8: memref<1x128xf32, #tpu.memory_space<vmem>>, %arg9: memref<1x4xf32, #tpu.memory_space<vmem>>, %arg10: memref<1x1xf32, #tpu.memory_space<smem>>, %arg11: memref<8x2xf32, #tpu.memory_space<vmem>>) attributes {dimension_semantics = [#tpu.dimension_semantics<parallel>], iteration_bounds = array<i64: 1>, scalar_prefetch = 0 : i64, scratch_operands = 0 : i64, tpu.core_type = #tpu.core_type<tc>, window_params = [{transform_indices = @transform_0, window_bounds = array<i64: 8, 16>}, {transform_indices = @transform_1, window_bounds = array<i64: 8, 4>}, {pipeline_mode = #tpu.pipeline_mode<synchronous>, transform_indices = @transform_2, window_bounds = array<i64: 16, 128>}, {pipeline_mode = #tpu.pipeline_mode<synchronous>, transform_indices = @transform_3, window_bounds = array<i64: 1, 128>}, {pipeline_mode = #tpu.pipeline_mode<synchronous>, transform_indices = @transform_4, window_bounds = array<i64: 128, 128>}, {pipeline_mode = #tpu.pipeline_mode<synchronous>, transform_indices = @transform_5, window_bounds = array<i64: 1, 128>}, {pipeline_mode = #tpu.pipeline_mode<synchronous>, transform_indices = @transform_6, window_bounds = array<i64: 128, 128>}, {pipeline_mode = #tpu.pipeline_mode<synchronous>, transform_indices = @transform_7, window_bounds = array<i64: 1, 128>}, {pipeline_mode = #tpu.pipeline_mode<synchronous>, transform_indices = @transform_8, window_bounds = array<i64: 1, 4>}, {transform_indices = @transform_9, window_bounds = array<i64: 1, 1>}, {transform_indices = @transform_10, window_bounds = array<i64: 8, 2>}]} {
    %c0 = arith.constant 0 : index
    %c0_0 = arith.constant 0 : index
    %0 = vector.load %arg1[%c0, %c0_0] : memref<8x16xf32, #tpu.memory_space<vmem>>, vector<8x16xf32>
    %c0_1 = arith.constant 0 : index
    %c0_2 = arith.constant 0 : index
    %1 = vector.load %arg3[%c0_1, %c0_2] : memref<16x128xf32, #tpu.memory_space<vmem>>, vector<16x128xf32>
    %cst = arith.constant dense<0.000000e+00> : vector<8x128xf32>
    %2 = tpu.matmul %0, %1, %cst {dimension_numbers = #tpu.dot_dimension_numbers<[1], [0], [0], [1], [0, 0, 1, 1], [], []>} : vector<8x16xf32>, vector<16x128xf32>, vector<8x128xf32> -> vector<8x128xf32>
    %c0_3 = arith.constant 0 : index
    %c0_4 = arith.constant 0 : index
    %3 = vector.load %arg4[%c0_3, %c0_4] : memref<1x128xf32, #tpu.memory_space<vmem>>, vector<1x128xf32>
    %4 = vector.broadcast %3 : vector<1x128xf32> to vector<8x128xf32>
    %5 = arith.addf %2, %4 : vector<8x128xf32>
    %6 = math.tanh %5 : vector<8x128xf32>
    %c0_5 = arith.constant 0 : index
    %c0_6 = arith.constant 0 : index
    %7 = vector.load %arg5[%c0_5, %c0_6] : memref<128x128xf32, #tpu.memory_space<vmem>>, vector<128x128xf32>
    %cst_7 = arith.constant dense<0.000000e+00> : vector<8x128xf32>
    %8 = tpu.matmul %6, %7, %cst_7 {dimension_numbers = #tpu.dot_dimension_numbers<[1], [0], [0], [1], [0, 0, 1, 1], [], []>} : vector<8x128xf32>, vector<128x128xf32>, vector<8x128xf32> -> vector<8x128xf32>
    %c0_8 = arith.constant 0 : index
    %c0_9 = arith.constant 0 : index
    %9 = vector.load %arg6[%c0_8, %c0_9] : memref<1x128xf32, #tpu.memory_space<vmem>>, vector<1x128xf32>
    %10 = vector.broadcast %9 : vector<1x128xf32> to vector<8x128xf32>
    %11 = arith.addf %8, %10 : vector<8x128xf32>
    %12 = math.tanh %11 : vector<8x128xf32>
    %c0_10 = arith.constant 0 : index
    %c0_11 = arith.constant 0 : index
    %13 = vector.load %arg7[%c0_10, %c0_11] : memref<128x128xf32, #tpu.memory_space<vmem>>, vector<128x128xf32>
    %cst_12 = arith.constant dense<0.000000e+00> : vector<8x128xf32>
    %14 = tpu.matmul %12, %13, %cst_12 {dimension_numbers = #tpu.dot_dimension_numbers<[1], [0], [0], [1], [0, 0, 1, 1], [], []>} : vector<8x128xf32>, vector<128x128xf32>, vector<8x128xf32> -> vector<8x128xf32>
    %c0_13 = arith.constant 0 : index
    %c0_14 = arith.constant 0 : index
    %15 = vector.load %arg8[%c0_13, %c0_14] : memref<1x128xf32, #tpu.memory_space<vmem>>, vector<1x128xf32>
    %16 = vector.broadcast %15 : vector<1x128xf32> to vector<8x128xf32>
    %17 = arith.addf %14, %16 : vector<8x128xf32>
    %18 = math.tanh %17 : vector<8x128xf32>
    %c0_15 = arith.constant 0 : index
    %c0_16 = arith.constant 0 : index
    %19 = vector.load %arg2[%c0_15, %c0_16] : memref<8x4xf32, #tpu.memory_space<vmem>>, vector<8x4xf32>
    %20 = vector.extract_strided_slice %18 {offsets = [0, 0], sizes = [8, 4], strides = [1, 1]} : vector<8x128xf32> to vector<8x4xf32>
    %21 = arith.subf %19, %20 : vector<8x4xf32>
    %22 = arith.mulf %21, %21 : vector<8x4xf32>
    %c0_17 = arith.constant 0 : index
    %c0_18 = arith.constant 0 : index
    %23 = vector.load %arg9[%c0_17, %c0_18] : memref<1x4xf32, #tpu.memory_space<vmem>>, vector<1x4xf32>
    %24 = vector.broadcast %23 : vector<1x4xf32> to vector<8x4xf32>
    %25 = arith.mulf %22, %24 : vector<8x4xf32>
    %cst_19 = arith.constant dense<0.000000e+00> : vector<8xf32>
    %26 = vector.multi_reduction <add>, %25, %cst_19 [1] : vector<8x4xf32> to vector<8xf32>
    %27 = vector.shape_cast %26 : vector<8xf32> to vector<8x1xf32>
    %c0_20 = arith.constant 0 : index
    %c0_21 = arith.constant 0 : index
    %28 = memref.load %arg10[%c0_20, %c0_21] : memref<1x1xf32, #tpu.memory_space<smem>>
    %cst_22 = arith.constant 5.000000e-01 : f32
    %29 = vector.broadcast %cst_22 : f32 to vector<8x1xf32>
    %30 = arith.mulf %29, %27 : vector<8x1xf32>
    %31 = vector.broadcast %28 : f32 to vector<8x1xf32>
    %32 = arith.subf %31, %30 : vector<8x1xf32>
    %33 = vector.extract_strided_slice %17 {offsets = [0, 4], sizes = [8, 1], strides = [1, 1]} : vector<8x128xf32> to vector<8x1xf32>
    %34 = tpu.concatenate %32, %33 in 1 : vector<8x1xf32>, vector<8x1xf32> -> vector<8x2xf32>
    %c0_23 = arith.constant 0 : index
    %c0_24 = arith.constant 0 : index
    %35 = vector.load %arg11[%c0_23, %c0_24] : memref<8x2xf32, #tpu.memory_space<vmem>>, vector<8x2xf32>
    tpu.vector_store %arg11[%c0_23, %c0_24], %34 {strides = array<i32>} : memref<8x2xf32, #tpu.memory_space<vmem>>, vector<8x2xf32>,
    return
  }
  func.func @transform_0(%arg0: i32) -> (i32, i32) {
    %c0_i32 = arith.constant 0 : i32
    %c0_i32_0 = arith.constant 0 : i32
    return %arg0, %c0_i32 : i32, i32
  }
  func.func @transform_1(%arg0: i32) -> (i32, i32) {
    %c0_i32 = arith.constant 0 : i32
    %c0_i32_0 = arith.constant 0 : i32
    return %arg0, %c0_i32 : i32, i32
  }
  func.func @transform_2(%arg0: i32) -> (i32, i32) {
    %c0_i32 = arith.constant 0 : i32
    %c0_i32_0 = arith.constant 0 : i32
    %c0_i32_1 = arith.constant 0 : i32
    return %c0_i32, %c0_i32_0 : i32, i32
  }
  func.func @transform_3(%arg0: i32) -> (i32, i32) {
    %c0_i32 = arith.constant 0 : i32
    %c0_i32_0 = arith.constant 0 : i32
    %c0_i32_1 = arith.constant 0 : i32
    return %c0_i32, %c0_i32_0 : i32, i32
  }
  func.func @transform_4(%arg0: i32) -> (i32, i32) {
    %c0_i32 = arith.constant 0 : i32
    %c0_i32_0 = arith.constant 0 : i32
    %c0_i32_1 = arith.constant 0 : i32
    return %c0_i32, %c0_i32_0 : i32, i32
  }
  func.func @transform_5(%arg0: i32) -> (i32, i32) {
    %c0_i32 = arith.constant 0 : i32
    %c0_i32_0 = arith.constant 0 : i32
    %c0_i32_1 = arith.constant 0 : i32
    return %c0_i32, %c0_i32_0 : i32, i32
  }
  func.func @transform_6(%arg0: i32) -> (i32, i32) {
    %c0_i32 = arith.constant 0 : i32
    %c0_i32_0 = arith.constant 0 : i32
    %c0_i32_1 = arith.constant 0 : i32
    return %c0_i32, %c0_i32_0 : i32, i32
  }
  func.func @transform_7(%arg0: i32) -> (i32, i32) {
    %c0_i32 = arith.constant 0 : i32
    %c0_i32_0 = arith.constant 0 : i32
    %c0_i32_1 = arith.constant 0 : i32
    return %c0_i32, %c0_i32_0 : i32, i32
  }
  func.func @transform_8(%arg0: i32) -> (i32, i32) {
    %c0_i32 = arith.constant 0 : i32
    %c0_i32_0 = arith.constant 0 : i32
    %c0_i32_1 = arith.constant 0 : i32
    return %c0_i32, %c0_i32_0 : i32, i32
  }
  func.func @transform_9(%arg0: i32) -> (i32, i32) {
    %c0_i32 = arith.constant 0 : i32
    %c0_i32_0 = arith.constant 0 : i32
    %c0_i32_1 = arith.constant 0 : i32
    return %c0_i32, %c0_i32_0 : i32, i32
  }
  func.func @transform_10(%arg0: i32) -> (i32, i32) {
    %c0_i32 = arith.constant 0 : i32
    %c0_i32_0 = arith.constant 0 : i32
    return %arg0, %c0_i32 : i32, i32
  }
}

</mosaic_0001>

<bundles_post_ra>
// kernel: tpu_custom_call.1
= control target key start
LH: loop header
LB: loop body
LE: loop exit
PB: predicated region body
PF: predicated region fallthrough
CT: control target
= control target key end

     0   :  { %16 = vsyncpa [#allocation4], 0  ;;  %s414_s0 = inlined_call_operand.vmem [shape: f32[8,16], index: 0, kind: input, shape index: {}]   ;;  %s415_s1 = inlined_call_operand.vmem [shape: f32[8,4], index: 1, kind: input, shape index: {}]   ;;  %s416_s2 = inlined_call_operand.hbm [shape: f32[16,128], index: 2, kind: input, shape index: {}]   ;;  %s417_s3 = inlined_call_operand.vmem [shape: f32[1,128], index: 3, kind: input, shape index: {}]   ;;  %s418_s4 = inlined_call_operand.hbm [shape: f32[128,128], index: 4, kind: input, shape index: {}]   ;;  %s419_s5 = inlined_call_operand.vmem [shape: f32[1,128], index: 5, kind: input, shape index: {}]   ;;  %s420_s6 = inlined_call_operand.hbm [shape: f32[128,128], index: 6, kind: input, shape index: {}]   ;;  %s421_s7 = inlined_call_operand.vmem [shape: f32[1,128], index: 7, kind: input, shape index: {}]   ;;  %s422_s8 = inlined_call_operand.vmem [shape: f32[1,4], index: 8, kind: input, shape index: {}]   ;;  %s423_s9 = inlined_call_operand.<no memory space> [shape: f32[1,1], index: 9, kind: input, shape index: {}]   ;;  %s424_s10 = inlined_call_operand.vmem [shape: f32[8,2], index: 10, kind: output, shape index: {}]  }
   0x1   :  { %17 = vsyncpa [#allocation6], 0  ;;  %s41_s15 = sshll.u32 %s418_s4, 4  ;;  %s320_s16 = smov [#allocation5]   ;;  %s42_s15 = int_to_ptr.hbm [resolvable:$true] %s41_s15 }
   0x2   :  { %s43_s17 = sshll.u32 %s320_s16, 4  ;;  %s26_s20 = sshll.u32 %s416_s2, 4  ;;  %s44_s17 = int_to_ptr.vmem [resolvable:$true] %s43_s17  ;;  %s27_s20 = int_to_ptr.hbm [resolvable:$true] %s26_s20 }
   0x3   :  { %s321_s21 = smov 128   ;;  %s322_s22 = smov 8  }
   0x4   :  { %49 = dma.hbm_to_vmem [thread:$0]  %s42_s15, 2048, %s44_s17, [#allocation6], %s321_s21, %s321_s21, %s322_s22  }
   0x5   :  { %s323_s23 = smov [#allocation3]   ;;  %s56_s27 = sshll.u32 %s420_s6, 4  ;;  %s57_s27 = int_to_ptr.hbm [resolvable:$true] %s56_s27 }
   0x6   :  { %s28_s24 = sshll.u32 %s323_s23, 4  ;;  %s324_s4 = smov [#allocation7]   ;;  %s29_s24 = int_to_ptr.vmem [resolvable:$true] %s28_s24 }
   0x7   :  { %34 = dma.hbm_to_vmem [thread:$0]  %s27_s20, 256, %s29_s24, [#allocation4], %s321_s21, %s321_s21, %s322_s22  }
   0x8   :  { %s58_s28 = sshll.u32 %s324_s4, 4  ;;  %s59_s28 = int_to_ptr.vmem [resolvable:$true] %s58_s28 }
   0x9   :  { %64 = dma.hbm_to_vmem [thread:$0]  %s57_s27, 2048, %s59_s28, [#allocation6], %s321_s21, %s321_s21, %s322_s22  }
   0xa   :  { %316 = dma.done.wait [#allocation4], 256  }
   0xb   :  { %317 = vsyncadd [#allocation4], 4294967040 }
   0xc   :  { %318 = dma.done.wait [#allocation6], 4096  }
   0xd   :  { %319 = vsyncadd [#allocation6], 4294963200  ;;  %v85_v0 = vld [vmem:[#allocation3 + $0x8] sm:$0xff]  ;;  %v84_v1 = vld [vmem:[#allocation3] sm:$0xff]  ;;  %vm90_vm0 = vcmask 130048   ;;  %vm205_vm1 = vcmask 31744   ;;  %v211_v55 = vstv %s423_s9 }
   0xe   :  { %108 = vmatpush.msra.mxu0 %v85_v0  ;;  %v83_v2 = vld [vmem:[%s414_s0] sm:$0xff]  ;;  %v130_v3 = vld [vmem:[#allocation5 + $0x78] sm:$0xff]  ;;  %v128_v5 = vld [vmem:[#allocation5 + $0x68] sm:$0xff]  ;;  %s325_s16 = smov 125   ;;  %vm217_vm2 = vcmask 7168   ;;  %vm219_vm3 = vcmask 15360  }
   0xf   :  { %v129_v4 = vld [vmem:[#allocation5 + $0x70] sm:$0xff]  ;;  %135 = vmatpush.msra.mxu1 %v130_v3  ;;  %v127_v6 = vld [vmem:[#allocation5 + $0x60] sm:$0xff]  ;;  %v126_v7 = vld [vmem:[#allocation5 + $0x58] sm:$0xff] }
  0x10   :  { %109 = vmatpush.msra.mxu0 %v84_v1  ;;  %v125_v8 = vld [vmem:[#allocation5 + $0x50] sm:$0xff]  ;;  %v124_v9 = vld [vmem:[#allocation5 + $0x48] sm:$0xff]  ;;  %v123_v10 = vld [vmem:[#allocation5 + $0x40] sm:$0xff] }
  0x11   :  { %227 = vmatmul.msk.f32.vlgmr.msra.gmra.mxu0 %vm90_vm0, %v83_v2  ;;  %136 = vmatpush.msra.mxu1 %v129_v4  ;;  %v122_v11 = vld [vmem:[#allocation5 + $0x38] sm:$0xff]  ;;  %v121_v12 = vld [vmem:[#allocation5 + $0x30] sm:$0xff]  ;;  %v120_v13 = vld [vmem:[#allocation5 + $0x28] sm:$0xff] }
  0x12   :  { %v119_v14 = vld [vmem:[#allocation5 + $0x20] sm:$0xff]  ;;  %v118_v15 = vld [vmem:[#allocation5 + $0x18] sm:$0xff]  ;;  %v117_v16 = vld [vmem:[#allocation5 + $0x10] sm:$0xff] }
  0x13   :  { %137 = vmatpush.msra.mxu1 %v128_v5  ;;  %v116_v17 = vld [vmem:[#allocation5 + $0x8] sm:$0xff]  ;;  %v115_v18 = vld [vmem:[#allocation5] sm:$0xff]  ;;  %v171_v19 = vld [vmem:[#allocation7 + $0x78] sm:$0xff] }
  0x14   :  { %v170_v20 = vld [vmem:[#allocation7 + $0x70] sm:$0xff]  ;;  %176 = vmatpush.msra.mxu2 %v171_v19  ;;  %v169_v21 = vld [vmem:[#allocation7 + $0x68] sm:$0xff]  ;;  %v168_v22 = vld [vmem:[#allocation7 + $0x60] sm:$0xff] }
  0x15   :  { %138 = vmatpush.msra.mxu1 %v127_v6  ;;  %v167_v23 = vld [vmem:[#allocation7 + $0x58] sm:$0xff]  ;;  %v166_v24 = vld [vmem:[#allocation7 + $0x50] sm:$0xff]  ;;  %v165_v25 = vld [vmem:[#allocation7 + $0x48] sm:$0xff] }
  0x16   :  { %177 = vmatpush.msra.mxu2 %v170_v20  ;;  %v164_v26 = vld [vmem:[#allocation7 + $0x40] sm:$0xff]  ;;  %v163_v27 = vld [vmem:[#allocation7 + $0x38] sm:$0xff]  ;;  %v162_v28 = vld [vmem:[#allocation7 + $0x30] sm:$0xff] }
  0x17   :  { %139 = vmatpush.msra.mxu1 %v126_v7  ;;  %v161_v29 = vld [vmem:[#allocation7 + $0x28] sm:$0xff]  ;;  %v234_v30 = vld [vmem:[%s417_s3] ss:$0 sm:$0xff]  ;;  %v160_v34 = vld [vmem:[#allocation7 + $0x20] sm:$0xff] }
  0x18   :  { %178 = vmatpush.msra.mxu2 %v169_v21  ;;  %v159_v35 = vld [vmem:[#allocation7 + $0x18] sm:$0xff]  ;;  %v158_v36 = vld [vmem:[#allocation7 + $0x10] sm:$0xff]  ;;  %v157_v37 = vld [vmem:[#allocation7 + $0x8] sm:$0xff] }
  0x19   :  { %140 = vmatpush.msra.mxu1 %v125_v8  ;;  %v156_v38 = vld [vmem:[#allocation7] sm:$0xff]  ;;  %v235_v39 = vld [vmem:[%s419_s5] ss:$0 sm:$0xff] }
  0x1a   :  { %179 = vmatpush.msra.mxu2 %v168_v22  ;;  %v236_v43 = vld [vmem:[%s421_s7] ss:$0 sm:$0xff] }
  0x1b   :  { %141 = vmatpush.msra.mxu1 %v124_v9  ;;  %v197_v46 = vld [vmem:[%s415_s1] sm:$0xff] }
  0x1c   :  { %180 = vmatpush.msra.mxu2 %v167_v23  ;;  %v237_v49 = vld [vmem:[%s422_s8] ss:$0 sm:$0xff] }
  0x1d   :  { %142 = vmatpush.msra.mxu1 %v123_v10 }
  0x1e   :  { %181 = vmatpush.msra.mxu2 %v166_v24 }
  0x1f   :  { %143 = vmatpush.msra.mxu1 %v122_v11 }
  0x20   :  { %182 = vmatpush.msra.mxu2 %v165_v25 }
  0x21   :  { %144 = vmatpush.msra.mxu1 %v121_v12 }
  0x22   :  { %183 = vmatpush.msra.mxu2 %v164_v26 }
  0x23   :  { %145 = vmatpush.msra.mxu1 %v120_v13 }
  0x24   :  { %184 = vmatpush.msra.mxu2 %v163_v27 }
  0x25   :  { %146 = vmatpush.msra.mxu1 %v119_v14 }
  0x26   :  { %185 = vmatpush.msra.mxu2 %v162_v28 }
  0x27   :  { %147 = vmatpush.msra.mxu1 %v118_v15 }
  0x28   :  { %186 = vmatpush.msra.mxu2 %v161_v29 }
  0x29   :  { %148 = vmatpush.msra.mxu1 %v117_v16 }
  0x2a   :  { %187 = vmatpush.msra.mxu2 %v160_v34 }
  0x2b   :  { %149 = vmatpush.msra.mxu1 %v116_v17 }
  0x2c   :  { %188 = vmatpush.msra.mxu2 %v159_v35 }
  0x2d   :  { %150 = vmatpush.msra.mxu1 %v115_v18 }
  0x2e   :  { %189 = vmatpush.msra.mxu2 %v158_v36 }
  0x30   :  { %190 = vmatpush.msra.mxu2 %v157_v37 }
  0x32   :  { %191 = vmatpush.msra.mxu2 %v156_v38 }
  0x8e   :  { %v111_v31 = vpop.f32.mrf.mxu0 }
  0x8f   :  { %v112_v32 = vadd.f32 %v234_v30, %v111_v31 }
  0x91   :  { %238 = vtanh.f32 %v112_v32 }
  0x97   :  { %v239_v33 = vpop.eup %238 }
  0x98   :  { %151 = vmatmul.f32.vlgmr.msra.gmra.mxu1 %v239_v33 }
 0x115   :  { %v152_v40 = vpop.f32.mrf.mxu1 }
 0x116   :  { %v153_v41 = vadd.f32 %v235_v39, %v152_v40 }
 0x118   :  { %240 = vtanh.f32 %v153_v41 }
 0x11e   :  { %v241_v42 = vpop.eup %240 }
 0x11f   :  { %192 = vmatmul.f32.vlgmr.msra.gmra.mxu2 %v241_v42 }
 0x1a2   :  { %v193_v44 = vpop.f32.mrf.mxu2 }
 0x1a3   :  { %v194_v45 = vadd.f32 %v236_v43, %v193_v44 }
 0x1a5   :  { %242 = vtanh.f32 %v194_v45 }
 0x1ab   :  { %v243_v47 = vpop.eup %242 }
 0x1ac   :  { %v198_v48 = vsub.f32 %v197_v46, %v243_v47 }
 0x1ae   :  { %v199_v50 = vmul.f32 %v198_v48, %v198_v48 }
 0x1b0   :  { %v204_v51 = vmul.f32 %v237_v49, %v199_v50 }
 0x1b2   :  { %v206_v52 = vsel %vm205_vm1, %v204_v51, 0.0 }
 0x1b3   :  { %207 = vadd.xlane.f32.xlu0 %v206_v52 }
 0x1c7   :  { %214 = vrot.lane.b32.xlu0 %v194_v45, %s325_s16 }
 0x226   :  { %v208_v53 = vpop.xlane.xlu0 %207 }
 0x227   :  { %v210_v54 = vmul.f32 0.5, %v208_v53 }
 0x229   :  { %v212_v56 = vsub.f32 %v211_v55, %v210_v54 }
 0x239   :  { %v215_v57 = vpop.permute.xlu0 %214 }
 0x23a   :  { %v218_v58 = vsel %vm217_vm2, %v212_v56, %v215_v57 }
 0x23b   :  { %220 = vst.msk [vmem:[%s424_s10] sm:$0xff] %vm219_vm3, %v218_v58 }
 0x23c   :  { %225 = vsyncpa [#allocation4], 1 }
 0x23d   :  { %226 = vsyncpa [#allocation6], 1 }

</bundles_post_ra>
